<compile_context>
chip_gen: v5e
topology: v5e:2x2
jax: 0.10.0
libtpu: 0.0.40
codegen_flags: <defaults>
</compile_context>

<pallas_src>
import math

import jax
import jax.numpy as jnp
from jax.experimental import pallas as pl
from jax.experimental.pallas import tpu as pltpu

_LANES = 128


def _nb_kernel(text_ref, w_ref, b_ref, out_ref, acc_ref):
    # grid = (batch tiles [parallel], vocab tiles [arbitrary / reduction]).
    k = pl.program_id(1)
    TB, S = text_ref.shape          # text tile: (batch, seqlen) — batch on sublanes
    TV = w_ref.shape[1]             # vocab tile width (multiple of 128)
    n_folds = TV // _LANES

    # Zero the lane-folded accumulator at the start of the vocab reduction.
    @pl.when(k == 0)
    def _():
        acc_ref[...] = jnp.zeros_like(acc_ref)

    # Vocab ids covered by this tile, laid out along lanes.
    v_idx = k * TV + jax.lax.broadcasted_iota(jnp.int32, (TB, TV), 1)

    # Presence indicator x[b, v] = any_s(text[b, s] == v)  (scatter of ones;
    # duplicate tokens do not add).  seqlen is small & static -> unrolled.
    presence = jnp.zeros((TB, TV), dtype=jnp.bool_)
    for s in range(S):
        tok = text_ref[:, s:s + 1]                       # (TB, 1) int32, sublane slice
        presence = jnp.logical_or(presence, tok == v_idx)

    # Masked W via a single select (broadcast of W hoisted out of the token loop).
    w_b = jnp.broadcast_to(w_ref[...], (TB, TV))         # (TB, TV)
    prod = jnp.where(presence, w_b, jnp.float32(0.0))    # (TB, TV)

    # Lane-fold: add 128-wide lane-aligned slices — pure VPU adds, no per-step
    # cross-lane reduction, unmasked (TB, 128) accumulator stores.
    fold = prod[:, 0:_LANES]
    for c in range(1, n_folds):
        fold = fold + prod[:, c * _LANES:(c + 1) * _LANES]
    acc_ref[...] += fold

    # Finalize once per batch tile: single XLU lane-reduce + bias + threshold.
    @pl.when(k == pl.num_programs(1) - 1)
    def _():
        y_ = jnp.sum(acc_ref[...], axis=1) + b_ref[0, 0]  # (TB,)
        out_ref[0, :] = (y_ < 0).astype(jnp.int32)
        out_ref[1, :] = (y_ >= 0).astype(jnp.int32)


def _pick_vocab_tile(v_pad, max_tv=4096):
    """Largest vocab tile <= max_tv that is a multiple of 128 and divides v_pad."""
    if v_pad <= max_tv:
        return v_pad
    for tv in range(max_tv, _LANES - 1, -_LANES):
        if v_pad % tv == 0:
            return tv
    return v_pad  # fallback: one tile covering everything


def naive_bayes_predict(text, W, b, *, tv=None, tb=None):
    """text: [seqlen, batch] int32 token ids; W: [vocab] f32; b: scalar f32.

    Returns boolean array of shape [2, batch] = stack([y_ < 0, y_ >= 0]).
    """
    S, B = text.shape
    V = W.shape[0]

    # Pad vocab to a multiple of 128 with zero weights (padded ids never match
    # real tokens, and their weight is 0 anyway).
    V_pad = pl.cdiv(V, _LANES) * _LANES
    w_pad = jnp.zeros((V_pad,), jnp.float32).at[:V].set(W.astype(jnp.float32))

    if tv is None:
        tv = _pick_vocab_tile(V_pad)
    assert V_pad % tv == 0 and tv % _LANES == 0

    # Batch tile: only tile batch (to feed the 2nd TensorCore on v7x) when it is
    # large enough to keep the last output dim a multiple of 128; otherwise a
    # single full-batch tile (lane rules require tb == B or tb % 128 == 0).
    if tb is None:
        tb = _LANES if (B > _LANES and B % _LANES == 0) else B
    assert B % tb == 0

    text_bs = text.T.astype(jnp.int32)                   # (B, S): batch on sublanes
    b2 = jnp.asarray(b, jnp.float32).reshape(1, 1)
    w2 = w_pad.reshape(1, V_pad)

    out_i32 = pl.pallas_call(
        _nb_kernel,
        out_shape=jax.ShapeDtypeStruct((2, B), jnp.int32),
        grid_spec=pltpu.PrefetchScalarGridSpec(
            num_scalar_prefetch=0,
            grid=(B // tb, V_pad // tv),                 # (parallel batch, vocab reduction)
            in_specs=[
                pl.BlockSpec((tb, S), lambda i, k: (i, 0)),          # text batch tile
                pl.BlockSpec((1, tv), lambda i, k: (0, k)),          # W vocab tile
                pl.BlockSpec(memory_space=pltpu.MemorySpace.SMEM),   # bias scalar
            ],
            out_specs=pl.BlockSpec((2, tb), lambda i, k: (0, i)),
            scratch_shapes=[pltpu.VMEM((tb, _LANES), jnp.float32)],  # lane-folded acc
        ),
        compiler_params=pltpu.CompilerParams(
            dimension_semantics=("parallel", "arbitrary"),
            vmem_limit_bytes=32 * 1024 * 1024,
        ),
    )(text_bs, w2, b2)
    return out_i32.astype(jnp.bool_)


def _reference_predict(text, W, b):
    """Pure-JAX reference matching the PyTorch module's forward."""
    S, B = text.shape
    V = W.shape[0]
    onehot = jax.nn.one_hot(text, V, dtype=jnp.float32)      # (S, B, V)
    presence = (onehot.sum(axis=0) > 0).astype(jnp.float32)  # (B, V)  scatter-of-ones
    y_ = presence @ W.astype(jnp.float32) + b                # (B,)
    return jnp.stack([y_ < 0, y_ >= 0], axis=0)              # (2, B)


if __name__ == "__main__":
    vocab_size = 512
    batch_size = 8
    seq_len = 8
    alpha = 1.0

    key = jax.random.PRNGKey(0)
    k_p, k_q, k_text = jax.random.split(key, 3)

    # Deterministic synthetic "training" statistics (shapes per __init__):
    # W = log(p / sum(p)) - log(q / sum(q)), b = log(N_p / N_m).
    p = alpha + 10.0 * jax.random.uniform(k_p, (vocab_size,), dtype=jnp.float32)
    q = alpha + 10.0 * jax.random.uniform(k_q, (vocab_size,), dtype=jnp.float32)
    W = jnp.log(p / jnp.sum(p)) - jnp.log(q / jnp.sum(q))
    N_p, N_m = 60.0, 40.0
    b = jnp.float32(math.log(N_p / N_m))

    # Example input: token ids, layout [seqlen, batch] (module convention).
    text = jax.random.randint(k_text, (seq_len, batch_size), 0, vocab_size,
                              dtype=jnp.int32)

    y = naive_bayes_predict(text, W, b)
    jax.block_until_ready(y)

    y_ref = _reference_predict(text, W, b)
    assert y.shape == (2, batch_size)
    assert y.dtype == jnp.bool_
    # Note: tile-wise f32 accumulation order differs from the reference's single
    # dot product; a sample with y_ ~ 0 could in principle flip class.  The
    # synthetic data here is nowhere near the decision boundary.
    assert bool(jnp.all(y == y_ref))

    print("KERNEL_OK")
</pallas_src>

<mosaic_0001>
module attributes {stable_mosaic.version = 11 : i64} {
  func.func @_nb_kernel(%arg0: i32, %arg1: i32, %arg2: memref<8x8xi32, #tpu.memory_space<vmem>>, %arg3: memref<1x512xf32, #tpu.memory_space<vmem>>, %arg4: memref<1x1xf32, #tpu.memory_space<smem>>, %arg5: memref<2x8xi32, #tpu.memory_space<vmem>>, %arg6: memref<8x128xf32, #tpu.memory_space<vmem>>) attributes {dimension_semantics = [#tpu.dimension_semantics<parallel>, #tpu.dimension_semantics<arbitrary>], iteration_bounds = array<i64: 1, 1>, scalar_prefetch = 0 : i64, scratch_operands = 1 : i64, tpu.core_type = #tpu.core_type<tc>, window_params = [{transform_indices = @transform_0, window_bounds = array<i64: 8, 8>}, {transform_indices = @transform_1, window_bounds = array<i64: 1, 512>}, {transform_indices = @transform_2, window_bounds = array<i64: 1, 1>}, {transform_indices = @transform_3, window_bounds = array<i64: 2, 8>}]} {
    %c0_i32 = arith.constant 0 : i32
    %0 = arith.cmpi eq, %arg1, %c0_i32 : i32
    %1 = arith.extui %0 : i1 to i32
    %c0_i32_0 = arith.constant 0 : i32
    %2 = arith.cmpi ne, %1, %c0_i32_0 : i32
    scf.if %2 {
      %cst_17 = arith.constant 0.000000e+00 : f32
      %58 = vector.broadcast %cst_17 : f32 to vector<8x128xf32>
      %c0_18 = arith.constant 0 : index
      %c0_19 = arith.constant 0 : index
      %59 = vector.load %arg6[%c0_18, %c0_19] : memref<8x128xf32, #tpu.memory_space<vmem>>, vector<8x128xf32>
      tpu.vector_store %arg6[%c0_18, %c0_19], %58 {strides = array<i32>} : memref<8x128xf32, #tpu.memory_space<vmem>>, vector<8x128xf32>,
    } else {
    }
    %c512_i32 = arith.constant 512 : i32
    %3 = arith.muli %arg1, %c512_i32 : i32
    %4 = tpu.iota {dimensions = array<i32: 1>} : vector<8x512xi32>
    %5 = vector.broadcast %3 : i32 to vector<8x512xi32>
    %6 = arith.addi %5, %4 : vector<8x512xi32>
    %false = arith.constant false
    %7 = vector.broadcast %false : i1 to vector<8x512xi1>
    %c0 = arith.constant 0 : index
    %c0_1 = arith.constant 0 : index
    %8 = vector.load %arg2[%c0, %c0_1] : memref<8x8xi32, #tpu.memory_space<vmem>>, vector<8x1xi32>
    %9 = vector.broadcast %8 : vector<8x1xi32> to vector<8x512xi32>
    %10 = arith.cmpi eq, %9, %6 : vector<8x512xi32>
    %11 = arith.ori %7, %10 : vector<8x512xi1>
    %c0_2 = arith.constant 0 : index
    %c1 = arith.constant 1 : index
    %12 = vector.load %arg2[%c0_2, %c1] : memref<8x8xi32, #tpu.memory_space<vmem>>, vector<8x1xi32>
    %13 = vector.broadcast %12 : vector<8x1xi32> to vector<8x512xi32>
    %14 = arith.cmpi eq, %13, %6 : vector<8x512xi32>
    %15 = arith.ori %11, %14 : vector<8x512xi1>
    %c0_3 = arith.constant 0 : index
    %c2 = arith.constant 2 : index
    %16 = vector.load %arg2[%c0_3, %c2] : memref<8x8xi32, #tpu.memory_space<vmem>>, vector<8x1xi32>
    %17 = vector.broadcast %16 : vector<8x1xi32> to vector<8x512xi32>
    %18 = arith.cmpi eq, %17, %6 : vector<8x512xi32>
    %19 = arith.ori %15, %18 : vector<8x512xi1>
    %c0_4 = arith.constant 0 : index
    %c3 = arith.constant 3 : index
    %20 = vector.load %arg2[%c0_4, %c3] : memref<8x8xi32, #tpu.memory_space<vmem>>, vector<8x1xi32>
    %21 = vector.broadcast %20 : vector<8x1xi32> to vector<8x512xi32>
    %22 = arith.cmpi eq, %21, %6 : vector<8x512xi32>
    %23 = arith.ori %19, %22 : vector<8x512xi1>
    %c0_5 = arith.constant 0 : index
    %c4 = arith.constant 4 : index
    %24 = vector.load %arg2[%c0_5, %c4] : memref<8x8xi32, #tpu.memory_space<vmem>>, vector<8x1xi32>
    %25 = vector.broadcast %24 : vector<8x1xi32> to vector<8x512xi32>
    %26 = arith.cmpi eq, %25, %6 : vector<8x512xi32>
    %27 = arith.ori %23, %26 : vector<8x512xi1>
    %c0_6 = arith.constant 0 : index
    %c5 = arith.constant 5 : index
    %28 = vector.load %arg2[%c0_6, %c5] : memref<8x8xi32, #tpu.memory_space<vmem>>, vector<8x1xi32>
    %29 = vector.broadcast %28 : vector<8x1xi32> to vector<8x512xi32>
    %30 = arith.cmpi eq, %29, %6 : vector<8x512xi32>
    %31 = arith.ori %27, %30 : vector<8x512xi1>
    %c0_7 = arith.constant 0 : index
    %c6 = arith.constant 6 : index
    %32 = vector.load %arg2[%c0_7, %c6] : memref<8x8xi32, #tpu.memory_space<vmem>>, vector<8x1xi32>
    %33 = vector.broadcast %32 : vector<8x1xi32> to vector<8x512xi32>
    %34 = arith.cmpi eq, %33, %6 : vector<8x512xi32>
    %35 = arith.ori %31, %34 : vector<8x512xi1>
    %c0_8 = arith.constant 0 : index
    %c7 = arith.constant 7 : index
    %36 = vector.load %arg2[%c0_8, %c7] : memref<8x8xi32, #tpu.memory_space<vmem>>, vector<8x1xi32>
    %37 = vector.broadcast %36 : vector<8x1xi32> to vector<8x512xi32>
    %38 = arith.cmpi eq, %37, %6 : vector<8x512xi32>
    %39 = arith.ori %35, %38 : vector<8x512xi1>
    %c0_9 = arith.constant 0 : index
    %c0_10 = arith.constant 0 : index
    %40 = vector.load %arg3[%c0_9, %c0_10] : memref<1x512xf32, #tpu.memory_space<vmem>>, vector<1x512xf32>
    %41 = vector.shape_cast %40 : vector<1x512xf32> to vector<1x512xf32>
    %42 = vector.broadcast %41 : vector<1x512xf32> to vector<8x512xf32>
    %cst = arith.constant 0.000000e+00 : f32
    %43 = vector.broadcast %cst : f32 to vector<8x512xf32>
    %44 = arith.select %39, %42, %43 : vector<8x512xi1>, vector<8x512xf32>
    %45 = vector.extract_strided_slice %44 {offsets = [0, 0], sizes = [8, 128], strides = [1, 1]} : vector<8x512xf32> to vector<8x128xf32>
    %46 = vector.extract_strided_slice %44 {offsets = [0, 128], sizes = [8, 128], strides = [1, 1]} : vector<8x512xf32> to vector<8x128xf32>
    %47 = arith.addf %45, %46 : vector<8x128xf32>
    %48 = vector.extract_strided_slice %44 {offsets = [0, 256], sizes = [8, 128], strides = [1, 1]} : vector<8x512xf32> to vector<8x128xf32>
    %49 = arith.addf %47, %48 : vector<8x128xf32>
    %50 = vector.extract_strided_slice %44 {offsets = [0, 384], sizes = [8, 128], strides = [1, 1]} : vector<8x512xf32> to vector<8x128xf32>
    %51 = arith.addf %49, %50 : vector<8x128xf32>
    %c0_11 = arith.constant 0 : index
    %c0_12 = arith.constant 0 : index
    %52 = vector.load %arg6[%c0_11, %c0_12] : memref<8x128xf32, #tpu.memory_space<vmem>>, vector<8x128xf32>
    %53 = arith.addf %52, %51 : vector<8x128xf32>
    %c0_13 = arith.constant 0 : index
    %c0_14 = arith.constant 0 : index
    %54 = vector.load %arg6[%c0_13, %c0_14] : memref<8x128xf32, #tpu.memory_space<vmem>>, vector<8x128xf32>
    tpu.vector_store %arg6[%c0_13, %c0_14], %53 {strides = array<i32>} : memref<8x128xf32, #tpu.memory_space<vmem>>, vector<8x128xf32>,
    %c0_i32_15 = arith.constant 0 : i32
    %55 = arith.cmpi eq, %arg1, %c0_i32_15 : i32
    %56 = arith.extui %55 : i1 to i32
    %c0_i32_16 = arith.constant 0 : i32
    %57 = arith.cmpi ne, %56, %c0_i32_16 : i32
    scf.if %57 {
      %c0_17 = arith.constant 0 : index
      %c0_18 = arith.constant 0 : index
      %58 = vector.load %arg6[%c0_17, %c0_18] : memref<8x128xf32, #tpu.memory_space<vmem>>, vector<8x128xf32>
      %cst_19 = arith.constant dense<0.000000e+00> : vector<8xf32>
      %59 = vector.multi_reduction <add>, %58, %cst_19 [1] : vector<8x128xf32> to vector<8xf32>
      %c0_20 = arith.constant 0 : index
      %c0_21 = arith.constant 0 : index
      %60 = memref.load %arg4[%c0_20, %c0_21] : memref<1x1xf32, #tpu.memory_space<smem>>
      %61 = vector.broadcast %60 : f32 to vector<8xf32>
      %62 = arith.addf %59, %61 : vector<8xf32>
      %cst_22 = arith.constant 0.000000e+00 : f32
      %63 = vector.broadcast %cst_22 : f32 to vector<8xf32>
      %64 = arith.cmpf olt, %62, %63 : vector<8xf32>
      %65 = arith.extui %64 : vector<8xi1> to vector<8xi32>
      %c0_23 = arith.constant 0 : index
      %c0_24 = arith.constant 0 : index
      %66 = vector.load %arg5[%c0_23, %c0_24] : memref<2x8xi32, #tpu.memory_space<vmem>>, vector<1x8xi32>
      %67 = vector.shape_cast %66 : vector<1x8xi32> to vector<8xi32>
      %68 = vector.shape_cast %65 : vector<8xi32> to vector<1x8xi32>
      tpu.vector_store %arg5[%c0_23, %c0_24], %68 {strides = array<i32>} : memref<2x8xi32, #tpu.memory_space<vmem>>, vector<1x8xi32>,
      %cst_25 = arith.constant 0.000000e+00 : f32
      %69 = vector.broadcast %cst_25 : f32 to vector<8xf32>
      %70 = arith.cmpf oge, %62, %69 : vector<8xf32>
      %71 = arith.extui %70 : vector<8xi1> to vector<8xi32>
      %c1_26 = arith.constant 1 : index
      %c0_27 = arith.constant 0 : index
      %72 = vector.load %arg5[%c1_26, %c0_27] : memref<2x8xi32, #tpu.memory_space<vmem>>, vector<1x8xi32>
      %73 = vector.shape_cast %72 : vector<1x8xi32> to vector<8xi32>
      %74 = vector.shape_cast %71 : vector<8xi32> to vector<1x8xi32>
      tpu.vector_store %arg5[%c1_26, %c0_27], %74 {strides = array<i32>} : memref<2x8xi32, #tpu.memory_space<vmem>>, vector<1x8xi32>,
    } else {
    }
    return
  }
  func.func @transform_0(%arg0: i32, %arg1: i32) -> (i32, i32) {
    %c0_i32 = arith.constant 0 : i32
    %c0_i32_0 = arith.constant 0 : i32
    return %arg0, %c0_i32 : i32, i32
  }
  func.func @transform_1(%arg0: i32, %arg1: i32) -> (i32, i32) {
    %c0_i32 = arith.constant 0 : i32
    %c0_i32_0 = arith.constant 0 : i32
    return %c0_i32, %arg1 : i32, i32
  }
  func.func @transform_2(%arg0: i32, %arg1: i32) -> (i32, i32) {
    %c0_i32 = arith.constant 0 : i32
    %c0_i32_0 = arith.constant 0 : i32
    %c0_i32_1 = arith.constant 0 : i32
    return %c0_i32, %c0_i32_0 : i32, i32
  }
  func.func @transform_3(%arg0: i32, %arg1: i32) -> (i32, i32) {
    %c0_i32 = arith.constant 0 : i32
    %c0_i32_0 = arith.constant 0 : i32
    return %c0_i32, %arg0 : i32, i32
  }
}

</mosaic_0001>

<bundles_post_ra>
// kernel: tpu_custom_call.1
= control target key start
LH: loop header
LB: loop body
LE: loop exit
PB: predicated region body
PF: predicated region fallthrough
CT: control target
= control target key end

     0   :  { %9 = vsyncpa [#allocation5], 0  ;;  %s388_s0 = inlined_call_operand.hbm [shape: s32[8,8], index: 0, kind: input, shape index: {}]   ;;  %s389_s1 = inlined_call_operand.hbm [shape: f32[1,512], index: 1, kind: input, shape index: {}]   ;;  %s390_s2 = inlined_call_operand.<no memory space> [shape: f32[1,1], index: 2, kind: input, shape index: {}]   ;;  %s391_s3 = inlined_call_operand.hbm [shape: s32[2,8], index: 3, kind: output, shape index: {}]  }
   0x1   :  { %10 = vsyncpa [#allocation8], 0 }
   0x2   :  { %11 = vsyncpa [#allocation6], 0  ;;  %s17_s14 = sshll.u32 %s388_s0, 4  ;;  %s299_s15 = smov [#allocation4]   ;;  %s18_s14 = int_to_ptr.hbm [resolvable:$true] %s17_s14 }
   0x3   :  { %s19_s16 = sshll.u32 %s299_s15, 4  ;;  %s28_s19 = sshll.u32 %s389_s1, 4  ;;  %s20_s16 = int_to_ptr.vmem [resolvable:$true] %s19_s16  ;;  %s29_s19 = int_to_ptr.hbm [resolvable:$true] %s28_s19 }
   0x4   :  { %22 = dma.hbm_to_vmem [thread:$0]  %s18_s14, 128, %s20_s16, [#allocation5]  }
   0x5   :  { %s300_s20 = smov [#allocation7]  }
   0x6   :  { %s30_s21 = sshll.u32 %s300_s20, 4  ;;  %s31_s21 = int_to_ptr.vmem [resolvable:$true] %s30_s21 }
   0x7   :  { %33 = dma.hbm_to_vmem [thread:$0]  %s29_s19, 64, %s31_s21, [#allocation8]  }
   0x8   :  { %293 = dma.done.wait [#allocation5], 128  }
   0x9   :  { %294 = vsyncadd [#allocation5], 4294967168 }
   0xa   :  { %295 = dma.done.wait [#allocation8], 64  }
   0xb   :  { %296 = vsyncadd [#allocation8], 4294967232  ;;  %v301_v0 = vmov 2   ;;  %v302_v1 = vmov 0   ;;  %v303_v2 = vmov 4   ;;  %v60_v3 = vld [vmem:[#allocation4] sm:$0xff]  ;;  %v50_v10 = vlaneseq }
   0xc   :  { %214 = vset.pattern.permute.xlu1 %v301_v0  ;;  %212 = vset.pattern.permute.xlu0 %v302_v1  ;;  %v304_v4 = vmov 3   ;;  %v305_v5 = vmov 1   ;;  %v306_v6 = vmov 5   ;;  %v307_v7 = vmov 6   ;;  %v145_v23 = vld [vmem:[#allocation7] sm:$0xf] }
   0xd   :  { %216 = vset.pattern.permute.xlu2 %v303_v2  ;;  %80 = vperm.xlu1 %214, %v60_v3   ;;  %v308_v8 = vmov 7   ;;  %v337_v12 = vand.u32 127, %v50_v10  ;;  %v392_v19 = vmov 0  ;;  %v395_v22 = vmov 0  ;;  %s309_s22 = smov [#allocation9]   ;;  %s190_s26 = sshll.u32 %s391_s3, 4  ;;  %s191_s26 = int_to_ptr.hbm [resolvable:$true] %s190_s26 }
   0xe   :  { %62 = vperm.xlu0 %212, %v60_v3   ;;  %102 = vperm.xlu2 %216, %v60_v3   ;;  %v147_v25 = vperm.slane %v145_v23, 0  ;;  %v148_v26 = vperm.slane %v145_v23, 1  ;;  %v149_v27 = vperm.slane %v145_v23, 2  ;;  %v150_v31 = vperm.slane %v145_v23, 3  ;;  %s188_s23 = sshll.u32 %s309_s22, 4  ;;  %s189_s23 = int_to_ptr.vmem [resolvable:$true] %s188_s23 }
   0xf   :  { %v52_v14 = vadd.s32 128, %v337_v12  ;;  %v53_v16 = vadd.s32 256, %v337_v12  ;;  %v344_v17 = vadd.s32 384, %v337_v12  ;;  %v172_v36 = vstv %s390_s2 }
  0x15   :  { %215 = vset.pattern.permute.xlu1 %v304_v4 }
  0x16   :  { %213 = vset.pattern.permute.xlu0 %v305_v5  ;;  %91 = vperm.xlu1 %215, %v60_v3  }
  0x17   :  { %69 = vperm.xlu0 %213, %v60_v3   ;;  %217 = vset.pattern.permute.xlu2 %v306_v6 }
  0x18   :  { %113 = vperm.xlu2 %217, %v60_v3  }
  0x1e   :  { %218 = vset.pattern.permute.xlu1 %v307_v7 }
  0x1f   :  { %220 = vset.pattern.permute.xlu0 %v308_v8  ;;  %124 = vperm.xlu1 %218, %v60_v3  }
  0x20   :  { %219 = vset.pattern.permute.xlu2 %v308_v8 }
  0x21   :  { %135 = vperm.xlu2 %219, %v60_v3  }
  0x68   :  { %v339_v13 = vpop.permute.xlu2 %102 }
  0x72   :  { %v114_v20 = vpop.permute.xlu2 %113 }
  0x7b   :  { %v136_v24 = vpop.permute.xlu2 %135 }
  0x7f   :  { %v81_v11 = vpop.permute.xlu1 %80 }
  0x80   :  { %v63_v9 = vpop.permute.xlu0 %62  ;;  %vm82_vm11 = vcmp.eq.s32.totalorder %v81_v11, %v337_v12  ;;  %vm83_vm13 = vcmp.eq.s32.totalorder %v81_v11, %v52_v14  ;;  %vm84_vm15 = vcmp.eq.s32.totalorder %v81_v11, %v53_v16 }
  0x81   :  { %vm64_vm2 = vcmp.eq.s32.totalorder %v63_v9, %v337_v12  ;;  %vm65_vm4 = vcmp.eq.s32.totalorder %v63_v9, %v52_v14  ;;  %vm66_vm7 = vcmp.eq.s32.totalorder %v63_v9, %v53_v16  ;;  %vm67_vm9 = vcmp.eq.s32.totalorder %v63_v9, %v344_v17 }
  0x88   :  { %v92_v18 = vpop.permute.xlu1 %91 }
  0x89   :  { %v70_v15 = vpop.permute.xlu0 %69 }
  0x8a   :  { %vm71_vm0 = vcmp.eq.s32.totalorder %v70_v15, %v337_v12  ;;  %vm72_vm1 = vcmp.eq.s32.totalorder %v70_v15, %v52_v14  ;;  %vm73_vm3 = vcmp.eq.s32.totalorder %v70_v15, %v53_v16  ;;  %vm74_vm5 = vcmp.eq.s32.totalorder %v70_v15, %v344_v17 }
  0x8b   :  { %vm75_vm6 = vmor %vm64_vm2, %vm71_vm0  ;;  %vm93_vm2 = vcmp.eq.s32.totalorder %v92_v18, %v337_v12 }
  0x8c   :  { %vm76_vm8 = vmor %vm65_vm4, %vm72_vm1  ;;  %vm94_vm4 = vcmp.eq.s32.totalorder %v92_v18, %v52_v14 }
  0x8d   :  { %vm77_vm10 = vmor %vm66_vm7, %vm73_vm3  ;;  %vm95_vm7 = vcmp.eq.s32.totalorder %v92_v18, %v53_v16 }
  0x8e   :  { %vm351_vm12 = vmor %vm67_vm9, %vm74_vm5  ;;  %vm104_vm9 = vcmp.eq.s32.totalorder %v339_v13, %v337_v12 }
  0x8f   :  { %v393_v19 = vsel %vm351_vm12, 4294967295, %v392_v19  ;;  %vm86_vm14 = vmor %vm75_vm6, %vm82_vm11  ;;  %vm85_vm6 = vcmp.eq.s32.totalorder %v81_v11, %v344_v17  ;;  %vm105_vm11 = vcmp.eq.s32.totalorder %v339_v13, %v52_v14 }
  0x90   :  { %vm87_vm0 = vmor %vm76_vm8, %vm83_vm13  ;;  %vm106_vm13 = vcmp.eq.s32.totalorder %v339_v13, %v53_v16 }
  0x91   :  { %vm88_vm1 = vmor %vm77_vm10, %vm84_vm15  ;;  %v125_v21 = vpop.permute.xlu1 %124  ;;  %vm394_vm10 = vnez %v393_v19 }
  0x92   :  { %vm97_vm3 = vmor %vm86_vm14, %vm93_vm2 }
  0x93   :  { %vm98_vm5 = vmor %vm87_vm0, %vm94_vm4  ;;  %vm115_vm0 = vcmp.eq.s32.totalorder %v114_v20, %v337_v12  ;;  %vm116_vm4 = vcmp.eq.s32.totalorder %v114_v20, %v52_v14 }
  0x94   :  { %vm99_vm12 = vmor %vm88_vm1, %vm95_vm7  ;;  %vm126_vm7 = vcmp.eq.s32.totalorder %v125_v21, %v337_v12 }
  0x95   :  { %vm108_vm8 = vmor %vm97_vm3, %vm104_vm9  ;;  %vm117_vm3 = vcmp.eq.s32.totalorder %v114_v20, %v53_v16 }
  0x96   :  { %vm363_vm15 = vmor %vm394_vm10, %vm85_vm6  ;;  %vm127_vm6 = vcmp.eq.s32.totalorder %v125_v21, %v52_v14 }
  0x97   :  { %v396_v22 = vsel %vm363_vm15, 4294967295, %v395_v22  ;;  %vm109_vm14 = vmor %vm98_vm5, %vm105_vm11  ;;  %vm128_vm15 = vcmp.eq.s32.totalorder %v125_v21, %v53_v16  ;;  %vm137_vm11 = vcmp.eq.s32.totalorder %v136_v24, %v337_v12 }
  0x98   :  { %vm110_vm2 = vmor %vm99_vm12, %vm106_vm13  ;;  %vm138_vm13 = vcmp.eq.s32.totalorder %v136_v24, %v52_v14 }
  0x99   :  { %vm119_vm1 = vmor %vm108_vm8, %vm115_vm0  ;;  %vm139_vm8 = vcmp.eq.s32.totalorder %v136_v24, %v53_v16 }
  0x9a   :  { %vm120_vm9 = vmor %vm109_vm14, %vm116_vm4 }
  0x9b   :  { %vm121_vm10 = vmor %vm110_vm2, %vm117_vm3  ;;  %vm96_vm2 = vcmp.eq.s32.totalorder %v92_v18, %v344_v17 }
  0x9c   :  { %vm130_vm5 = vmor %vm119_vm1, %vm126_vm7  ;;  %vm107_vm1 = vcmp.eq.s32.totalorder %v339_v13, %v344_v17  ;;  %vm129_vm7 = vcmp.eq.s32.totalorder %v125_v21, %v344_v17 }
  0x9d   :  { %vm131_vm12 = vmor %vm120_vm9, %vm127_vm6  ;;  %vm397_vm6 = vnez %v396_v22 }
  0x9e   :  { %vm132_vm0 = vmor %vm121_vm10, %vm128_vm15  ;;  %vm118_vm15 = vcmp.eq.s32.totalorder %v114_v20, %v344_v17  ;;  %vm140_vm10 = vcmp.eq.s32.totalorder %v136_v24, %v344_v17 }
  0x9f   :  { %vm141_vm4 = vmor %vm130_vm5, %vm137_vm11 }
  0xa0   :  { %vm142_vm14 = vmor %vm131_vm12, %vm138_vm13  ;;  %v155_v28 = vsel %vm141_vm4, %v147_v25, 0.0  ;;  %vm177_vm4 = vcmask 57344  }
  0xa1   :  { %vm143_vm3 = vmor %vm132_vm0, %vm139_vm8  ;;  %v156_v29 = vsel %vm142_vm14, %v148_v26, 0.0 }
  0xa2   :  { %vm100_vm9 = vmor %vm397_vm6, %vm96_vm2  ;;  %v159_v30 = vadd.f32 %v156_v29, %v155_v28  ;;  %v157_v32 = vsel %vm143_vm3, %v149_v27, 0.0 }
  0xa3   :  { %vm111_vm5 = vmor %vm100_vm9, %vm107_vm1 }
  0xa4   :  { %vm122_vm11 = vmor %vm111_vm5, %vm118_vm15  ;;  %v160_v33 = vadd.f32 %v159_v30, %v157_v32 }
  0xa5   :  { %vm133_vm12 = vmor %vm122_vm11, %vm129_vm7 }
  0xa6   :  { %vm144_vm13 = vmor %vm133_vm12, %vm140_vm10 }
  0xa7   :  { %v158_v34 = vsel %vm144_vm13, %v150_v31, 0.0 }
  0xa8   :  { %v161_v35 = vadd.f32 %v160_v33, %v158_v34 }
  0xaa   :  { %169 = vadd.xlane.f32.xlu0 %v161_v35 }
 0x11d   :  { %v170_v37 = vpop.xlane.xlu0 %169 }
 0x11e   :  { %v173_v38 = vadd.f32 %v172_v36, %v170_v37 }
 0x120   :  { %vm174_vm0 = vcmp.lt.f32.partialorder %v173_v38, 0.0  ;;  %vm179_vm8 = vcmp.ge.f32.partialorder %v173_v38, 0.0 }
 0x121   :  { %v175_v39 = vsel %vm174_vm0, 1, %v302_v1  ;;  %v180_v40 = vsel %vm179_vm8, 1, %v302_v1 }
 0x122   :  { %v176_v41 = vperm.slane %v175_v39, %v337_v12  ;;  %v181_v42 = vperm.slane %v180_v40, %v337_v12 }
 0x124   :  { %178 = vst.msk [vmem:[#allocation9] sm:$0x1] %vm177_vm4, %v176_v41 }
 0x125   :  { %182 = vst.msk [vmem:[#allocation9 + $0x1] sm:$0x1] %vm177_vm4, %v181_v42 }
 0x126   :  { %193 = dma.vmem_to_hbm [thread:$0]  %s189_s23, 32, %s191_s26, [#allocation6]  }
 0x127   :  { %297 = dma.done.wait [#allocation6], 32  }
 0x128   :  { %298 = vsyncadd [#allocation6], 4294967264 }
 0x129   :  { %198 = vsyncpa [#allocation5], 1 }
 0x12a   :  { %199 = vsyncpa [#allocation8], 1 }
 0x12b   :  { %200 = vsyncpa [#allocation6], 1 }

</bundles_post_ra>
